<compile_context>
chip_gen: v6e
topology: v6e:2x2x1
jax: 0.10.0
libtpu: 0.0.40
codegen_flags: <defaults>
</compile_context>

<pallas_src>
from functools import partial

import jax
import jax.numpy as jnp
from jax.experimental import pallas as pl
from jax.experimental.pallas import tpu as pltpu


def _layernorm_kernel(x_ref, g_ref, o_ref, *, eps):
    # x_ref: (1, C, TS) tile — lanes = spatial, sublanes = channels.
    # g_ref: (1, C, 1) gamma (resident across the grid).
    # o_ref: (1, C, TS) output tile.
    x = x_ref[...].astype(jnp.float32)
    mean = jnp.mean(x, axis=1, keepdims=True)          # sublane (channel) reduce
    xc = x - mean
    var = jnp.mean(xc * xc, axis=1, keepdims=True)     # unbiased=False
    inv = jax.lax.rsqrt(var + eps)                     # EUP rsqrt (free slot)
    g = g_ref[...].astype(jnp.float32)
    o_ref[...] = (xc * inv * g).astype(o_ref.dtype)


def _choose_tile_s(S, C, itemsize):
    """Largest lane-dense (multiple-of-128) spatial tile within a VMEM budget."""
    if S <= 128:
        return S  # block == full dim is always legal
    # VMEM cost per lane: padded-C sublanes * itemsize, for in + out,
    # each double-buffered -> factor 4.
    c_pad = max(8, ((C + 7) // 8) * 8)
    budget = 8 * 1024 * 1024
    max_lanes = max(128, budget // (4 * c_pad * itemsize))
    tile = min(max_lanes, ((S + 127) // 128) * 128, 8192)
    return max(128, (tile // 128) * 128)


def layernorm_channel(x, gamma, *, eps=1e-5):
    """LayerNorm over channel dim of NCDHW x; gamma has shape (1, C, 1, 1, 1)."""
    B, C, D, H, W = x.shape
    S = D * H * W
    x3 = x.reshape(B, C, S)                  # free reshape (merges trailing dims)
    g3 = gamma.reshape(1, C, 1).astype(x.dtype)

    itemsize = jnp.dtype(x.dtype).itemsize
    tile_s = _choose_tile_s(S, C, itemsize)
    grid = (B, pl.cdiv(S, tile_s))           # partial last block is masked

    kernel = partial(_layernorm_kernel, eps=float(eps))
    out3 = pl.pallas_call(
        kernel,
        out_shape=jax.ShapeDtypeStruct((B, C, S), x.dtype),
        grid_spec=pltpu.PrefetchScalarGridSpec(
            num_scalar_prefetch=0,
            grid=grid,
            in_specs=[
                pl.BlockSpec((1, C, tile_s), lambda b, s: (b, 0, s)),  # x tile
                pl.BlockSpec((1, C, 1), lambda b, s: (0, 0, 0)),       # gamma
            ],
            out_specs=pl.BlockSpec((1, C, tile_s), lambda b, s: (b, 0, s)),
        ),
        compiler_params=pltpu.CompilerParams(
            dimension_semantics=("parallel", "parallel"),
        ),
    )(x3, g3)

    return out3.reshape(B, C, D, H, W)


if __name__ == "__main__":
    key = jax.random.PRNGKey(0)
    kx, kg = jax.random.split(key, 2)

    B, C, D, H, W = 2, 4, 8, 8, 8
    eps = 1e-5
    x = jax.random.normal(kx, (B, C, D, H, W), dtype=jnp.float32)
    # torch init is ones; use a perturbed gamma for a stronger correctness check.
    gamma = 1.0 + 0.1 * jax.random.normal(kg, (1, C, 1, 1, 1), dtype=jnp.float32)

    out = layernorm_channel(x, gamma, eps=eps)
    out = jax.block_until_ready(out)

    # Pure-JAX reference matching the PyTorch forward exactly.
    mean = jnp.mean(x, axis=1, keepdims=True)
    var = jnp.mean((x - mean) ** 2, axis=1, keepdims=True)   # unbiased=False
    ref = (x - mean) / jnp.sqrt(var + eps) * gamma

    assert out.shape == x.shape and out.dtype == x.dtype
    assert jnp.allclose(out, ref, atol=1e-5, rtol=1e-5), "mismatch vs reference"

    print("KERNEL_OK")
</pallas_src>

<mosaic_0001>
module attributes {stable_mosaic.version = 11 : i64} {
  func.func @_layernorm_kernel(%arg0: i32, %arg1: i32, %arg2: memref<1x4x512xf32, #tpu.memory_space<vmem>>, %arg3: memref<1x4x1xf32, #tpu.memory_space<vmem>>, %arg4: memref<1x4x512xf32, #tpu.memory_space<vmem>>) attributes {dimension_semantics = [#tpu.dimension_semantics<parallel>, #tpu.dimension_semantics<parallel>], iteration_bounds = array<i64: 2, 1>, scalar_prefetch = 0 : i64, scratch_operands = 0 : i64, tpu.core_type = #tpu.core_type<tc>, window_params = [{transform_indices = @transform_0, window_bounds = array<i64: 1, 4, 512>}, {pipeline_mode = #tpu.pipeline_mode<synchronous>, transform_indices = @transform_1, window_bounds = array<i64: 1, 4, 1>}, {transform_indices = @transform_2, window_bounds = array<i64: 1, 4, 512>}]} {
    %c0 = arith.constant 0 : index
    %c0_0 = arith.constant 0 : index
    %c0_1 = arith.constant 0 : index
    %0 = vector.load %arg2[%c0, %c0_0, %c0_1] : memref<1x4x512xf32, #tpu.memory_space<vmem>>, vector<1x4x512xf32>
    %cst = arith.constant dense<0.000000e+00> : vector<1x512xf32>
    %1 = vector.multi_reduction <add>, %0, %cst [1] : vector<1x4x512xf32> to vector<1x512xf32>
    %2 = vector.shape_cast %1 : vector<1x512xf32> to vector<1x1x512xf32>
    %cst_2 = arith.constant 4.000000e+00 : f32
    %3 = vector.broadcast %cst_2 : f32 to vector<1x1x512xf32>
    %4 = arith.divf %2, %3 : vector<1x1x512xf32>
    %5 = vector.broadcast %4 : vector<1x1x512xf32> to vector<1x4x512xf32>
    %6 = arith.subf %0, %5 : vector<1x4x512xf32>
    %7 = arith.mulf %6, %6 : vector<1x4x512xf32>
    %cst_3 = arith.constant dense<0.000000e+00> : vector<1x512xf32>
    %8 = vector.multi_reduction <add>, %7, %cst_3 [1] : vector<1x4x512xf32> to vector<1x512xf32>
    %9 = vector.shape_cast %8 : vector<1x512xf32> to vector<1x1x512xf32>
    %cst_4 = arith.constant 4.000000e+00 : f32
    %10 = vector.broadcast %cst_4 : f32 to vector<1x1x512xf32>
    %11 = arith.divf %9, %10 : vector<1x1x512xf32>
    %cst_5 = arith.constant 9.99999974E-6 : f32
    %12 = vector.broadcast %cst_5 : f32 to vector<1x1x512xf32>
    %13 = arith.addf %11, %12 : vector<1x1x512xf32>
    %14 = math.rsqrt %13 : vector<1x1x512xf32>
    %c0_6 = arith.constant 0 : index
    %c0_7 = arith.constant 0 : index
    %c0_8 = arith.constant 0 : index
    %15 = vector.load %arg3[%c0_6, %c0_7, %c0_8] : memref<1x4x1xf32, #tpu.memory_space<vmem>>, vector<1x4x1xf32>
    %16 = vector.broadcast %14 : vector<1x1x512xf32> to vector<1x4x512xf32>
    %17 = arith.mulf %6, %16 : vector<1x4x512xf32>
    %18 = vector.broadcast %15 : vector<1x4x1xf32> to vector<1x4x512xf32>
    %19 = arith.mulf %17, %18 : vector<1x4x512xf32>
    %c0_9 = arith.constant 0 : index
    %c0_10 = arith.constant 0 : index
    %c0_11 = arith.constant 0 : index
    %20 = vector.load %arg4[%c0_9, %c0_10, %c0_11] : memref<1x4x512xf32, #tpu.memory_space<vmem>>, vector<1x4x512xf32>
    tpu.vector_store %arg4[%c0_9, %c0_10, %c0_11], %19 {strides = array<i32>} : memref<1x4x512xf32, #tpu.memory_space<vmem>>, vector<1x4x512xf32>,
    return
  }
  func.func @transform_0(%arg0: i32, %arg1: i32) -> (i32, i32, i32) {
    %c0_i32 = arith.constant 0 : i32
    %c0_i32_0 = arith.constant 0 : i32
    return %arg0, %c0_i32, %arg1 : i32, i32, i32
  }
  func.func @transform_1(%arg0: i32, %arg1: i32) -> (i32, i32, i32) {
    %c0_i32 = arith.constant 0 : i32
    %c0_i32_0 = arith.constant 0 : i32
    %c0_i32_1 = arith.constant 0 : i32
    %c0_i32_2 = arith.constant 0 : i32
    return %c0_i32, %c0_i32_0, %c0_i32_1 : i32, i32, i32
  }
  func.func @transform_2(%arg0: i32, %arg1: i32) -> (i32, i32, i32) {
    %c0_i32 = arith.constant 0 : i32
    %c0_i32_0 = arith.constant 0 : i32
    return %arg0, %c0_i32, %arg1 : i32, i32, i32
  }
}

</mosaic_0001>

<bundles_post_ra>
// kernel: tpu_custom_call.1
= control target key start
LH: loop header
LB: loop body
LE: loop exit
PB: predicated region body
PF: predicated region fallthrough
CT: control target
= control target key end

     0   :  { %7 = vsyncpa [#allocation3], 0  ;;  %s784_s0 = inlined_call_operand.hbm [shape: f32[2,4,512], index: 0, kind: input, shape index: {}]   ;;  %s785_s1 = inlined_call_operand.vmem [shape: f32[1,4,1], index: 1, kind: input, shape index: {}]   ;;  %s786_s2 = inlined_call_operand.hbm [shape: f32[2,4,512], index: 2, kind: output, shape index: {}]  }
   0x1   :  { %9 = vsyncpa [#allocation3 + $0x1], 0 }
   0x2   :  { %10 = vsyncpa [#allocation4], 0 }
   0x3   :  { %12 = vsyncpa [#allocation4 + $0x1], 0  ;;  %s629_s9 = smov 0   ;;  %s631_s10 = smov 0  }
   0x4   :  { %s633_s11 = smov 0   ;;  %s635_s12 = smov 0  }
   0x5   :  { %s637_s13 = smov 0   ;;  %s639_s14 = smov 0  }
   0x6 LB: > { %s408_s15 = sadd.s32 4294967295, %s608_s14   ;;  %s409_s16 = sadd.s32 4294967294, %s608_s14   ;;  %s608_s14 = sphi %s639_s14, %s18_s14   ;;  %s604_s13 = sphi %s637_s13, %s798_s13   ;;  %s600_s12 = sphi %s635_s12, %s797_s12   ;;  %s596_s11 = sphi %s633_s11, %s796_s11   ;;  %s592_s10 = sphi %s631_s10, %s795_s10   ;;  %s588_s9 = sphi %s629_s9, %s794_s9  }
   0x7   : > { %s30_s17 = sadd.s32 1, %s604_s13  ;;  %s39_s18 = sadd.s32 1, %s596_s11 }
   0x8   : > { %p32_p0 = scmp.ge.s32.totalorder %s30_s17, 2  ;;  %p46_p1 = scmp.ne.s32.totalorder %s596_s11, %s592_s10 }
   0x9   : > { %p47_p2 = scmp.eq.s32.totalorder %s608_s14, 0  ;;  %p52_p3 = scmp.ne.s32.totalorder %s592_s10, %s588_s9 }
   0xa   : > { %s800_s17 = smov (%p32_p0, %s30_s17), 0  ;;  %p53_p5 = scmp.eq.s32.totalorder %s408_s15, 0 }
   0xb   : > { %p670_p4 = por %p47_p2, %p46_p1  ;;  %s34_s20 = ssub.s32 %s604_s13, %s800_s17 }
   0xc   : > { %p99_p6 = scmp.eq.s32.totalorder %s408_s15, 1  ;;  %p37_p7 = scmp.eq.s32.totalorder %s34_s20, 0 }
   0xd   : > { %p676_p8 = por %p53_p5, %p52_p3  ;;  %p105_p10 = scmp.eq.s32.totalorder %s409_s16, 1 }
   0xe   : > { %p680_p9 = por %p99_p6, %p46_p1  ;;  %p437_p13 = scmp.lt.s32.totalorder %s608_s14, 2 }
   0xf   : > { %s685_s23 = scalar_select %p37_p7, %s596_s11, %s39_s18  }
  0x10   : > { %p687_p11 = por %p105_p10, %p52_p3  ;;  %s128_s25 = sand.u32 1, %s596_s11  }
  0x11   : > { %s412_s26 = sshll.u32 %s128_s25, 4  ;;  %s423_s27 = sshll.u32 %s604_s13, 8 }
  0x12   : > { %s790_s24 = scalar_select %p687_p11, 1, 0 }
  0x13   : > { %s140_s30 = scalar_lea.hbm %s784_s0, %s423_s27  ;;  %s132_s3 = scalar_lea.vmem [#allocation2], %s412_s26 }
  0x14   : > { %s142_s4 = sshll.u32 %s132_s3, 4  ;;  %p700_p0 = pnand %p437_p13, %p670_p4  ;;  %s143_s4 = int_to_ptr.vmem [resolvable:$true] %s142_s4 }
  0x15   : > { %p415_p1 = scmp.ge.s32.totalorder %s608_s14, 1  ;;  %p147_p2 = scmp.lt.s32.totalorder %s608_s14, 3 }
  0x16   : > { %s129_s6 = scalar_lea.sflag [#allocation3], %s128_s25  ;;  %p502_p3 = pneg %p700_p0 }
  0x17   : > { %s513_s7 = scalar_lea.vmem %s143_s4, 256  ;;  %s610_s8 = smov [#allocation2]  }
  0x18   : > { %p514_p5 = scmp.ne.s32.totalorder %s143_s4, %s513_s7  ;;  %s518_s15 = sshll.u32 %s610_s8, 4  ;;  %s519_s15 = int_to_ptr.vmem [resolvable:$false] %s518_s15 }
  0x19   : > { %s520_s16 = scalar_lea.vmem %s519_s15, 512  ;;  %p521_p10 = scmp.lt.s32.totalorder %s143_s4, %s519_s15 }
  0x1a   : > { %p516_p6 = pnand %p514_p5, %p502_p3  ;;  %p522_p12 = scmp.lt.s32.totalorder %s520_s16, %s513_s7 }
  0x1c   : > { %p517_p7 = pneg %p516_p6  ;;  %p523_p4 = por %p522_p12, %p521_p10 }
  0x1e   : > { %p524_p13 = pnand %p523_p4, %p517_p7 }
  0x20   : > { %527 = shalt.err (!%p524_p13)
}
  0x21   : > { %432 = dma.hbm_to_vmem [thread:$0]  (!%p700_p0), %s140_s30, 256, %s143_s4, %s129_s6  }
  0x22   : > { %p148_p11 = pnand %p415_p1, %p147_p2 }
  0x23   : > { %s715_s18 = sand.u32 (!%p148_p11), 1, %s592_s10  }
  0x24   : > { %151 = sbr.rel (%p148_p11) target bundleno = 185 (0xb9), region = 28  ;;  %s416_s19 = sshll.u32 (!%p148_p11), %s715_s18, 4 }
  0x25   : > { %s154_s20 = scalar_lea.sflag (!%p148_p11), [#allocation3], %s715_s18  ;;  %s157_s25 = scalar_lea.vmem (!%p148_p11), [#allocation2], %s416_s19 }
  0x29   : > { %579 = dma.done.wait (%p676_p8), %s154_s20, 256  }
  0x2a   : > { %581 = vsyncadd (%p676_p8), %s154_s20, 4294967040  ;;  %v611_v0 = vmov 0   ;;  %v280_v1 = vld [vmem:[%s785_s1] sm:$0xf]  ;;  %v181_v3 = vld [vmem:[%s157_s25 + $0x8] sm:$0xff]  ;;  %vm188_vm0 = vcmask 1043456  }
  0x2b   : > { %489 = vset.pattern.permute.xlu0 %v611_v0  ;;  %v180_v2 = vld [vmem:[%s157_s25] sm:$0xff]  ;;  %v185_v5 = vcombine.high %v181_v3, %v181_v3  ;;  %v203_v8 = vsel %vm188_vm0, %v181_v3, 0.0  ;;  %s424_s21 = sshll.u32 %s600_s12, 8  ;;  %s177_s28 = scalar_lea.vmem [#allocation5], %s416_s19 }
  0x2c   : > { %293 = vperm.xlu0 %489, %v280_v1   ;;  %v184_v4 = vcombine.high %v180_v2, %v180_v2  ;;  %v189_v6 = vsel %vm188_vm0, %v180_v2, 0.0  ;;  %v204_v12 = vrot.slane %v203_v8, 4  ;;  %s324_s29 = sshll.u32 %s177_s28, 4  ;;  %s742_s4 = scalar_lea.hbm %s786_s2, %s424_s21  ;;  %s325_s29 = int_to_ptr.vmem [resolvable:$true] %s324_s29 }
  0x2d   : > { %v210_v9 = vsel %vm188_vm0, %v185_v5, 0.0  ;;  %v190_v10 = vrot.slane %v189_v6, 4  ;;  %s308_s5 = scalar_lea.sflag [#allocation4], %s715_s18  ;;  %s528_s6 = scalar_lea.vmem %s325_s29, 256 }
  0x2e   : > { %v196_v7 = vsel %vm188_vm0, %v184_v4, 0.0  ;;  %v211_v13 = vrot.slane %v210_v9, 4  ;;  %v205_v16 = vadd.f32 %v204_v12, %v203_v8  ;;  %p529_p8 = scmp.ne.s32.totalorder %s325_s29, %s528_s6  ;;  %s613_s12 = smov [#allocation5]  }
  0x2f   : > { %v197_v11 = vrot.slane %v196_v7, 4  ;;  %v191_v14 = vadd.f32 %v190_v10, %v189_v6  ;;  %s532_s7 = sshll.u32 %s613_s12, 4  ;;  %s533_s7 = int_to_ptr.vmem [resolvable:$false] %s532_s7 }
  0x30   : > { %v212_v17 = vadd.f32 %v211_v13, %v210_v9  ;;  %v206_v20 = vrot.slane %v205_v16, 2  ;;  %p530_p11 = pnand %p529_p8, %p680_p9  ;;  %s534_s8 = scalar_lea.vmem %s533_s7, 512 }
  0x31   : > { %v198_v15 = vadd.f32 %v197_v11, %v196_v7  ;;  %v192_v18 = vrot.slane %v191_v14, 2  ;;  %p535_p0 = scmp.lt.s32.totalorder %s325_s29, %s533_s7  ;;  %p536_p1 = scmp.lt.s32.totalorder %s534_s8, %s528_s6 }
  0x32   : > { %v213_v21 = vrot.slane %v212_v17, 2  ;;  %v207_v24 = vadd.f32 %v206_v20, %v205_v16  ;;  %p531_p12 = pneg %p530_p11 }
  0x33   : > { %v199_v19 = vrot.slane %v198_v15, 2  ;;  %v193_v22 = vadd.f32 %v192_v18, %v191_v14  ;;  %p537_p2 = por %p536_p1, %p535_p0 }
  0x34   : > { %v214_v25 = vadd.f32 %v213_v21, %v212_v17  ;;  %v208_v28 = vrot.slane %v207_v24, 1  ;;  %v298_v21 = vlaneseq }
  0x35   : > { %v200_v23 = vadd.f32 %v199_v19, %v198_v15  ;;  %v194_v26 = vrot.slane %v193_v22, 1  ;;  %v612_v19 = vmov 839922192   ;;  %p538_p3 = pnand %p537_p2, %p531_p12 }
  0x36   : > { %v215_v29 = vrot.slane %v214_v25, 1  ;;  %v209_v32 = vadd.f32 %v208_v28, %v207_v24  ;;  %v296_v20 = vunpack.c.l.s4 %v612_v19 }
  0x37   : > { %v201_v27 = vrot.slane %v200_v23, 1  ;;  %v195_v30 = vadd.f32 %v194_v26, %v193_v22  ;;  %v299_v26 = vshrl.u32 %v298_v21, 7 }
  0x38   : > { %v216_v33 = vadd.f32 %v215_v29, %v214_v25  ;;  %v220_v36 = vmul.f32 0.25, %v209_v32  ;;  %v297_v25 = vunpack.c.0.s8 %v296_v20 }
  0x39   : > { %v202_v31 = vadd.f32 %v201_v27, %v200_v23  ;;  %v218_v34 = vmul.f32 0.25, %v195_v30 }
  0x3a   : > { %v221_v37 = vmul.f32 0.25, %v216_v33  ;;  %v300_v29 = vsub.s32 %v297_v25, %v299_v26 }
  0x3b   : > { %v219_v35 = vmul.f32 0.25, %v202_v31 }
  0x3c   : > { %v227_v39 = vcombine.low %v220_v36, %v221_v37 }
  0x3d   : > { %v226_v38 = vcombine.low %v218_v34, %v219_v35 }
  0x3e   : > { %v231_v41 = vsub.f32 %v181_v3, %v227_v39 }
  0x3f   : > { %v230_v40 = vsub.f32 %v180_v2, %v226_v38 }
  0x40   : > { %v233_v43 = vmul.f32 %v231_v41, %v231_v41 }
  0x41   : > { %v232_v42 = vmul.f32 %v230_v40, %v230_v40 }
  0x42   : > { %v237_v45 = vcombine.high %v233_v43, %v233_v43  ;;  %v254_v47 = vsel %vm188_vm0, %v233_v43, 0.0 }
  0x43   : > { %v236_v44 = vcombine.high %v232_v42, %v232_v42  ;;  %v240_v46 = vsel %vm188_vm0, %v232_v42, 0.0  ;;  %v255_v51 = vrot.slane %v254_v47, 4 }
  0x44   : > { %v241_v49 = vrot.slane %v240_v46, 4  ;;  %v261_v50 = vsel %vm188_vm0, %v237_v45, 0.0 }
  0x45   : > { %v247_v48 = vsel %vm188_vm0, %v236_v44, 0.0  ;;  %v262_v53 = vrot.slane %v261_v50, 4  ;;  %v256_v55 = vadd.f32 %v255_v51, %v254_v47 }
  0x46   : > { %v248_v52 = vrot.slane %v247_v48, 4  ;;  %v242_v54 = vadd.f32 %v241_v49, %v240_v46 }
  0x47   : > { %v263_v57 = vadd.f32 %v262_v53, %v261_v50  ;;  %v257_v59 = vrot.slane %v256_v55, 2 }
  0x48   : > { %v249_v56 = vadd.f32 %v248_v52, %v247_v48  ;;  %v243_v58 = vrot.slane %v242_v54, 2 }
  0x49   : > { %v264_v61 = vrot.slane %v263_v57, 2  ;;  %v258_v63 = vadd.f32 %v257_v59, %v256_v55 }
  0x4a   : > { %v250_v60 = vrot.slane %v249_v56, 2  ;;  %v244_v62 = vadd.f32 %v243_v58, %v242_v54 }
  0x4b   : > { %v265_v1 = vadd.f32 %v264_v61, %v263_v57  ;;  %v259_v3 = vrot.slane %v258_v63, 1 }
  0x4c   : > { %v251_v0 = vadd.f32 %v250_v60, %v249_v56  ;;  %v245_v2 = vrot.slane %v244_v62, 1 }
  0x4d   : > { %v266_v5 = vrot.slane %v265_v1, 1  ;;  %v260_v7 = vadd.f32 %v259_v3, %v258_v63 }
  0x4e   : > { %v252_v4 = vrot.slane %v251_v0, 1  ;;  %v246_v6 = vadd.f32 %v245_v2, %v244_v62 }
  0x4f   : > { %v267_v9 = vadd.f32 %v266_v5, %v265_v1  ;;  %v270_v11 = vmul.f32 0.25, %v260_v7 }
  0x50   : > { %v253_v8 = vadd.f32 %v252_v4, %v251_v0  ;;  %v268_v10 = vmul.f32 0.25, %v246_v6 }
  0x51   : > { %v271_v13 = vmul.f32 0.25, %v267_v9  ;;  %v274_v15 = vadd.f32 1e-05, %v270_v11 }
  0x52   : > { %v269_v12 = vmul.f32 0.25, %v253_v8  ;;  %v272_v14 = vadd.f32 1e-05, %v268_v10 }
  0x53   : > { %v275_v17 = vadd.f32 1e-05, %v271_v13 }
  0x54   : > { %v273_v16 = vadd.f32 1e-05, %v269_v12  ;;  %492 = vrsqrt.f32 %v272_v14 }
  0x55   : > { %494 = vrsqrt.f32 %v274_v15 }
  0x56   : > { %496 = vrsqrt.f32 %v273_v16 }
  0x57   : > { %498 = vrsqrt.f32 %v275_v17 }
  0x61   : > { %v493_v18 = vpop.eup %492 }
  0x62   : > { %v495_v22 = vpop.eup %494 }
  0x63   : > { %v497_v23 = vpop.eup %496 }
  0x64   : > { %v499_v24 = vpop.eup %498  ;;  %v285_v27 = vcombine.low %v493_v18, %v497_v23 }
  0x65   : > { %v286_v28 = vcombine.low %v495_v22, %v499_v24 }
  0x66   : > { %v289_v30 = vmul.f32 %v285_v27, %v230_v40 }
  0x67   : > { %v290_v31 = vmul.f32 %v286_v28, %v231_v41 }
  0xa7   : > { %v294_v32 = vpop.permute.xlu0 %293 }
  0xa8   : > { %v301_v33 = vrot.slane %v294_v32, %v300_v29 }
  0xaa   : > { %v303_v34 = vmul.f32 %v301_v33, %v289_v30  ;;  %v304_v35 = vmul.f32 %v301_v33, %v290_v31 }
  0xac   : > { %305 = vst [vmem:[%s177_s28] sm:$0xff] %v303_v34  ;;  %306 = vst [vmem:[%s177_s28 + $0x8] sm:$0xff] %v304_v35 }
  0xad   : > { %541 = shalt.err (!%p538_p3)
}
  0xae   : > { %s542_s15 = scalar_lea.hbm %s742_s4, 256  ;;  %s546_s19 = scalar_lea.hbm %s786_s2, 512 }
  0xaf   : > { %p543_p5 = scmp.ne.s32.totalorder %s742_s4, %s542_s15  ;;  %p547_p10 = scmp.lt.s32.totalorder %s742_s4, %s786_s2 }
  0xb0   : > { %p548_p4 = scmp.lt.s32.totalorder %s546_s19, %s542_s15 }
  0xb1   : > { %p544_p6 = pnand %p543_p5, %p680_p9 }
  0xb2   : > { %p549_p13 = por %p548_p4, %p547_p10 }
  0xb3   : > { %p545_p7 = pneg %p544_p6 }
  0xb5   : > { %p550_p8 = pnand %p549_p13, %p545_p7 }
  0xb7   : > { %553 = shalt.err (!%p550_p8)
}
  0xb8   : > { %427 = dma.vmem_to_hbm [thread:$0]  (%p680_p9), %s325_s29, 256, %s742_s4, %s308_s5  }
  0xb9 PF: > { %s336_s26 = sand.u32 1, %s588_s9   ;;  %p792_p11 = scmp.ne.s32.totalorder %s790_s24, 0 }
  0xba   : > { %p793_p12 = scmp.ge.s32.totalorder %s608_s14, 2  ;;  %s337_s27 = scalar_lea.sflag [#allocation4], %s336_s26 }
  0xbc   : > { %p434_p0 = pnand %p793_p12, %p792_p11 }
  0xbe   : > { %p435_p1 = pneg %p434_p0 }
  0xc0   : > { %583 = dma.done.wait (%p435_p1), %s337_s27, 256  }
  0xc1   : > { %585 = vsyncadd (%p435_p1), %s337_s27, 4294967040  ;;  %s18_s14 = sadd.s32 1, %s608_s14   ;;  %s794_s9 = smov %s592_s10 }
  0xc2   : > { %p15_p2 = scmp.ge.s32.totalorder %s18_s14, 4   ;;  %s795_s10 = smov %s596_s11 }
  0xc3   : > { %s796_s11 = smov %s685_s23  ;;  %s797_s12 = smov %s604_s13 }
  0xc4   : > { %s798_s13 = smov %s800_s17  ;;  %17 = sbr.rel (!%p15_p2) target bundleno = 6 (0x6), region = 73 }
  0xc9   :  { %342 = vsyncpa [#allocation3], 1 }
  0xca   :  { %344 = vsyncpa [#allocation3 + $0x1], 1 }
  0xcb   :  { %345 = vsyncpa [#allocation4], 1 }
  0xcc   :  { %347 = vsyncpa [#allocation4 + $0x1], 1 }

</bundles_post_ra>
